<compile_context>
chip_gen: v7x
topology: tpu7x:2x2x1
jax: 0.10.0
libtpu: 0.0.40
codegen_flags: <defaults>
</compile_context>

<pallas_src>
import functools

import jax
import jax.numpy as jnp
from jax.experimental import pallas as pl
from jax.experimental.pallas import tpu as pltpu

_LANES = 128
_SUBLANES = 8


def _policy_kernel(x_ref, w1_ref, b1_ref, w2_ref, b2_ref, out_ref, *, use_bf16_matmul):
    x = x_ref[...]                                   # (TB, S)  f32
    if use_bf16_matmul:
        # weights are already bf16 (pre-cast once in the wrapper); only the
        # streamed activations are cast here (wrapper cast would add an HBM pass).
        x = x.astype(jnp.bfloat16)

    # Layer 1: Linear + ReLU (f32 accumulation, f32 bias/epilogue).
    h = jnp.dot(x, w1_ref[...], preferred_element_type=jnp.float32) + b1_ref[...]
    h = jnp.maximum(h, 0.0)                          # (TB, Hp)

    if use_bf16_matmul:
        h = h.astype(jnp.bfloat16)

    # Layer 2: Linear (natural, un-padded action dim A).
    logits = jnp.dot(h, w2_ref[...], preferred_element_type=jnp.float32) + b2_ref[...]

    # Numerically stable softmax over the last dim, exact normalization.
    m = jnp.max(logits, axis=-1, keepdims=True)
    e = jnp.exp(logits - m)
    denom = jnp.sum(e, axis=-1, keepdims=True)
    out_ref[...] = (e / denom).astype(out_ref.dtype)


def _round_up(x, m):
    return ((x + m - 1) // m) * m


def _choose_batch_tiling(B, batch_tile):
    """Pick (TB, Bp, n_steps): TB multiple of 8, Bp = TB * n_steps >= B.

    n_steps is forced to >= 2 (and even) whenever the batch is big enough so the
    'parallel' batch axis can shard across v7x's two TensorCores; harmless on
    single-TC v5e/v6e.  TB is derived from cdiv so batch padding is < 8 rows +
    per-step rounding, not a whole tile.
    """
    Bp8 = _round_up(B, _SUBLANES)
    n_steps = pl.cdiv(Bp8, batch_tile)
    if Bp8 >= 2 * _SUBLANES:
        n_steps = max(n_steps, 2)
    if n_steps > 1 and n_steps % 2 == 1:
        n_steps += 1
    TB = _round_up(pl.cdiv(Bp8, n_steps), _SUBLANES)
    Bp = TB * n_steps
    return TB, Bp, n_steps


def policy_network_forward(state, w1, b1, w2, b2, *, use_bf16_matmul=False,
                           batch_tile=8192, out_dtype=None):
    """state: (B, S); w1: (S, H); b1: (H,); w2: (H, A); b2: (A,) -> (B, A) probs."""
    B, S = state.shape
    H = w1.shape[1]
    A = w2.shape[1]
    out_dtype = state.dtype if out_dtype is None else out_dtype

    # Lane-dense padding of the hidden dim only. Results are unchanged:
    # zero-padded hidden units stay 0 through ReLU and their w2 rows are zero.
    Hp = _round_up(H, _LANES)
    w1p = jnp.pad(w1, ((0, 0), (0, Hp - H)))
    b1p = jnp.pad(b1, (0, Hp - H)).reshape(1, Hp)
    w2p = jnp.pad(w2, ((0, Hp - H), (0, 0)))          # (Hp, A) — natural action dim
    b2p = b2.reshape(1, A)

    if use_bf16_matmul:
        # Pre-cast once; avoids per-grid-step VPU casts and halves resident
        # weight VMEM. bf16 MXU operands are native on v5e/v6e/v7x.
        w1p = w1p.astype(jnp.bfloat16)
        w2p = w2p.astype(jnp.bfloat16)

    # Batch tiling: weights stay VMEM-resident across the grid; activations and
    # (un-padded) outputs stream tile-by-tile under double buffering.
    TB, Bp, n_steps = _choose_batch_tiling(B, batch_tile)
    x = state if Bp == B else jnp.pad(state, ((0, Bp - B), (0, 0)))
    grid = (n_steps,)

    flops = 2 * Bp * (S * Hp + Hp * A)
    bytes_accessed = (4 * (Bp * S + S * Hp + Hp + Hp * A + A)
                      + Bp * A * jnp.dtype(out_dtype).itemsize)
    cost = pl.CostEstimate(flops=flops, transcendentals=Bp * A,
                           bytes_accessed=bytes_accessed)

    out = pl.pallas_call(
        functools.partial(_policy_kernel, use_bf16_matmul=use_bf16_matmul),
        out_shape=jax.ShapeDtypeStruct((Bp, A), out_dtype),
        grid=grid,
        in_specs=[
            pl.BlockSpec((TB, S), lambda i: (i, 0)),     # activations stream
            pl.BlockSpec((S, Hp), lambda i: (0, 0)),     # weights resident
            pl.BlockSpec((1, Hp), lambda i: (0, 0)),
            pl.BlockSpec((Hp, A), lambda i: (0, 0)),
            pl.BlockSpec((1, A), lambda i: (0, 0)),
        ],
        out_specs=pl.BlockSpec((TB, A), lambda i: (i, 0)),  # un-padded, masked vst
        compiler_params=pltpu.CompilerParams(
            dimension_semantics=("parallel",)),
        cost_estimate=cost,
    )(x, w1p, b1p, w2p, b2p)

    return out if Bp == B else out[:B]


def init_params(key, state_space_size, action_space_size, dtype=jnp.float32):
    """Mirror torch.nn.Linear default init: U(-1/sqrt(fan_in), +1/sqrt(fan_in))."""
    hidden = 2 * state_space_size
    k1, k2, k3, k4 = jax.random.split(key, 4)
    bound1 = 1.0 / jnp.sqrt(float(state_space_size))
    bound2 = 1.0 / jnp.sqrt(float(hidden))
    w1 = jax.random.uniform(k1, (state_space_size, hidden), dtype, -bound1, bound1)
    b1 = jax.random.uniform(k2, (hidden,), dtype, -bound1, bound1)
    w2 = jax.random.uniform(k3, (hidden, action_space_size), dtype, -bound2, bound2)
    b2 = jax.random.uniform(k4, (action_space_size,), dtype, -bound2, bound2)
    return w1, b1, w2, b2


def _reference(state, w1, b1, w2, b2):
    h = jnp.maximum(state @ w1 + b1, 0.0)
    return jax.nn.softmax(h @ w2 + b2, axis=-1)


if __name__ == "__main__":
    state_space_size = 32
    action_space_size = 16
    batch = 8

    key = jax.random.PRNGKey(0)
    k_params, k_state, k_state2 = jax.random.split(key, 3)
    w1, b1, w2, b2 = init_params(k_params, state_space_size, action_space_size)
    state = jax.random.normal(k_state, (batch, state_space_size), jnp.float32)
    ref = _reference(state, w1, b1, w2, b2)

    # f32 MXU-operand path (exact math; exact softmax normalization).
    out = jax.block_until_ready(policy_network_forward(state, w1, b1, w2, b2))
    assert out.shape == (batch, action_space_size)
    assert jnp.allclose(out, ref, atol=1e-4), "f32 path mismatch vs reference"
    assert jnp.allclose(jnp.sum(out, axis=-1), 1.0, atol=1e-5), "rows must sum to 1"

    # Larger, non-multiple-of-8 batch to exercise the multi-step grid + padding.
    big_batch = 300
    state_big = jax.random.normal(k_state2, (big_batch, state_space_size), jnp.float32)
    ref_big = _reference(state_big, w1, b1, w2, b2)
    out_big = jax.block_until_ready(policy_network_forward(state_big, w1, b1, w2, b2))
    assert out_big.shape == (big_batch, action_space_size)
    assert jnp.allclose(out_big, ref_big, atol=1e-4), "multi-step path mismatch"

    # bf16 MXU-operand path (fast path on v5e/v6e/v7x) — looser tolerance.
    out_bf16 = jax.block_until_ready(
        policy_network_forward(state, w1, b1, w2, b2, use_bf16_matmul=True))
    assert out_bf16.shape == (batch, action_space_size)
    assert jnp.allclose(out_bf16, ref, atol=5e-2), "bf16 path mismatch vs reference"
    assert jnp.allclose(jnp.sum(out_bf16, axis=-1), 1.0, atol=1e-5)

    print("KERNEL_OK")
</pallas_src>

<mosaic_0001>
module attributes {stable_mosaic.version = 11 : i64} {
  func.func @_policy_kernel(%arg0: i32, %arg1: memref<8x32xf32, #tpu.memory_space<vmem>>, %arg2: memref<32x128xf32, #tpu.memory_space<vmem>>, %arg3: memref<1x128xf32, #tpu.memory_space<vmem>>, %arg4: memref<128x16xf32, #tpu.memory_space<vmem>>, %arg5: memref<1x16xf32, #tpu.memory_space<vmem>>, %arg6: memref<8x16xf32, #tpu.memory_space<vmem>>) attributes {dimension_semantics = [#tpu.dimension_semantics<parallel>], iteration_bounds = array<i64: 1>, scalar_prefetch = 0 : i64, scratch_operands = 0 : i64, tpu.core_type = #tpu.core_type<tc>, window_params = [{transform_indices = @transform_0, window_bounds = array<i64: 8, 32>}, {pipeline_mode = #tpu.pipeline_mode<synchronous>, transform_indices = @transform_1, window_bounds = array<i64: 32, 128>}, {pipeline_mode = #tpu.pipeline_mode<synchronous>, transform_indices = @transform_2, window_bounds = array<i64: 1, 128>}, {pipeline_mode = #tpu.pipeline_mode<synchronous>, transform_indices = @transform_3, window_bounds = array<i64: 128, 16>}, {pipeline_mode = #tpu.pipeline_mode<synchronous>, transform_indices = @transform_4, window_bounds = array<i64: 1, 16>}, {transform_indices = @transform_5, window_bounds = array<i64: 8, 16>}]} {
    %c0 = arith.constant 0 : index
    %c0_0 = arith.constant 0 : index
    %0 = vector.load %arg1[%c0, %c0_0] : memref<8x32xf32, #tpu.memory_space<vmem>>, vector<8x32xf32>
    %c0_1 = arith.constant 0 : index
    %c0_2 = arith.constant 0 : index
    %1 = vector.load %arg2[%c0_1, %c0_2] : memref<32x128xf32, #tpu.memory_space<vmem>>, vector<32x128xf32>
    %cst = arith.constant dense<0.000000e+00> : vector<8x128xf32>
    %2 = tpu.matmul %0, %1, %cst {dimension_numbers = #tpu.dot_dimension_numbers<[1], [0], [0], [1], [0, 0, 1, 1], [], []>} : vector<8x32xf32>, vector<32x128xf32>, vector<8x128xf32> -> vector<8x128xf32>
    %c0_3 = arith.constant 0 : index
    %c0_4 = arith.constant 0 : index
    %3 = vector.load %arg3[%c0_3, %c0_4] : memref<1x128xf32, #tpu.memory_space<vmem>>, vector<1x128xf32>
    %4 = vector.broadcast %3 : vector<1x128xf32> to vector<8x128xf32>
    %5 = arith.addf %2, %4 : vector<8x128xf32>
    %cst_5 = arith.constant 0.000000e+00 : f32
    %6 = vector.broadcast %cst_5 : f32 to vector<8x128xf32>
    %7 = arith.maximumf %5, %6 : vector<8x128xf32>
    %c0_6 = arith.constant 0 : index
    %c0_7 = arith.constant 0 : index
    %8 = vector.load %arg4[%c0_6, %c0_7] : memref<128x16xf32, #tpu.memory_space<vmem>>, vector<128x16xf32>
    %cst_8 = arith.constant dense<0.000000e+00> : vector<8x16xf32>
    %9 = tpu.matmul %7, %8, %cst_8 {dimension_numbers = #tpu.dot_dimension_numbers<[1], [0], [0], [1], [0, 0, 1, 1], [], []>} : vector<8x128xf32>, vector<128x16xf32>, vector<8x16xf32> -> vector<8x16xf32>
    %c0_9 = arith.constant 0 : index
    %c0_10 = arith.constant 0 : index
    %10 = vector.load %arg5[%c0_9, %c0_10] : memref<1x16xf32, #tpu.memory_space<vmem>>, vector<1x16xf32>
    %11 = vector.broadcast %10 : vector<1x16xf32> to vector<8x16xf32>
    %12 = arith.addf %9, %11 : vector<8x16xf32>
    %cst_11 = arith.constant dense<0xFF800000> : vector<8xf32>
    %13 = vector.multi_reduction <maximumf>, %12, %cst_11 [1] : vector<8x16xf32> to vector<8xf32>
    %14 = vector.shape_cast %13 : vector<8xf32> to vector<8x1xf32>
    %15 = vector.broadcast %14 : vector<8x1xf32> to vector<8x16xf32>
    %16 = arith.subf %12, %15 : vector<8x16xf32>
    %17 = math.exp %16 : vector<8x16xf32>
    %cst_12 = arith.constant dense<0.000000e+00> : vector<8xf32>
    %18 = vector.multi_reduction <add>, %17, %cst_12 [1] : vector<8x16xf32> to vector<8xf32>
    %19 = vector.shape_cast %18 : vector<8xf32> to vector<8x1xf32>
    %20 = vector.broadcast %19 : vector<8x1xf32> to vector<8x16xf32>
    %21 = arith.divf %17, %20 : vector<8x16xf32>
    %c0_13 = arith.constant 0 : index
    %c0_14 = arith.constant 0 : index
    %22 = vector.load %arg6[%c0_13, %c0_14] : memref<8x16xf32, #tpu.memory_space<vmem>>, vector<8x16xf32>
    tpu.vector_store %arg6[%c0_13, %c0_14], %21 {strides = array<i32>} : memref<8x16xf32, #tpu.memory_space<vmem>>, vector<8x16xf32>,
    return
  }
  func.func @transform_0(%arg0: i32) -> (i32, i32) {
    %c0_i32 = arith.constant 0 : i32
    %c0_i32_0 = arith.constant 0 : i32
    return %arg0, %c0_i32 : i32, i32
  }
  func.func @transform_1(%arg0: i32) -> (i32, i32) {
    %c0_i32 = arith.constant 0 : i32
    %c0_i32_0 = arith.constant 0 : i32
    %c0_i32_1 = arith.constant 0 : i32
    return %c0_i32, %c0_i32_0 : i32, i32
  }
  func.func @transform_2(%arg0: i32) -> (i32, i32) {
    %c0_i32 = arith.constant 0 : i32
    %c0_i32_0 = arith.constant 0 : i32
    %c0_i32_1 = arith.constant 0 : i32
    return %c0_i32, %c0_i32_0 : i32, i32
  }
  func.func @transform_3(%arg0: i32) -> (i32, i32) {
    %c0_i32 = arith.constant 0 : i32
    %c0_i32_0 = arith.constant 0 : i32
    %c0_i32_1 = arith.constant 0 : i32
    return %c0_i32, %c0_i32_0 : i32, i32
  }
  func.func @transform_4(%arg0: i32) -> (i32, i32) {
    %c0_i32 = arith.constant 0 : i32
    %c0_i32_0 = arith.constant 0 : i32
    %c0_i32_1 = arith.constant 0 : i32
    return %c0_i32, %c0_i32_0 : i32, i32
  }
  func.func @transform_5(%arg0: i32) -> (i32, i32) {
    %c0_i32 = arith.constant 0 : i32
    %c0_i32_0 = arith.constant 0 : i32
    return %arg0, %c0_i32 : i32, i32
  }
}

</mosaic_0001>

<bundles_post_ra>
// kernel: tpu_custom_call.1
= control target key start
LH: loop header
LB: loop body
LE: loop exit
PB: predicated region body
PF: predicated region fallthrough
CT: control target
= control target key end

     0   :  { %v361_v3 = vmov 0.0|0.0   ;;  %vm362_vm0 = vmmov 0   ;;  %v363_v6 = vmov 0.0   ;;  %s479_s0 = inlined_call_operand.vmem [shape: f32[8,32], index: 0, kind: input, shape index: {}]   ;;  %s480_s1 = inlined_call_operand.vmem [shape: f32[32,128], index: 1, kind: input, shape index: {}]   ;;  %s481_s2 = inlined_call_operand.vmem [shape: f32[1,128], index: 2, kind: input, shape index: {}]   ;;  %s482_s3 = inlined_call_operand.vmem [shape: f32[128,16], index: 3, kind: input, shape index: {}]   ;;  %s483_s4 = inlined_call_operand.vmem [shape: f32[1,16], index: 4, kind: input, shape index: {}]   ;;  %s484_s5 = inlined_call_operand.hbm [shape: f32[8,16], index: 5, kind: output, shape index: {}]  }
   0x1   :  { %v22_v0 = vld [vmem:[%s480_s1] sm:$0xff]  ;;  %v23_v1 = vld [vmem:[%s480_s1 + $0x8] sm:$0xff]  ;;  %v24_v2 = vld [vmem:[%s480_s1 + $0x10] sm:$0xff]  ;;  %299 = vmatprep.subr.bf16.mxu0 %v361_v3  ;;  %261 = vmatprep.mubr.msk.f32.mxu0 %vm362_vm0, %v363_v6 }
   0x2   :  { %v300_v4 = vpack.c.bf16 %v23_v1, %v22_v0  ;;  %v25_v5 = vld [vmem:[%s480_s1 + $0x18] sm:$0xff]  ;;  %v108_v7 = vld [vmem:[%s482_s3] sm:$0xff]  ;;  %305 = vmatprep.subr.bf16.mxu1 %v361_v3  ;;  %v109_v8 = vld [vmem:[%s482_s3 + $0x8] sm:$0xff]  ;;  %296 = vmatprep.mubr.msk.f32.mxu1 %vm362_vm0, %v363_v6 }
   0x3   :  { %v110_v9 = vld [vmem:[%s482_s3 + $0x10] sm:$0xff]  ;;  %v111_v10 = vld [vmem:[%s482_s3 + $0x18] sm:$0xff]  ;;  %v303_v11 = vpack.c.bf16 %v25_v5, %v24_v2  ;;  %v306_v12 = vpack.c.bf16 %v109_v8, %v108_v7  ;;  %v112_v14 = vld [vmem:[%s482_s3 + $0x20] sm:$0xff] }
   0x4   :  { %301 = vmatpush3.bf16.msra.mxu0 %v300_v4  ;;  %v309_v13 = vpack.c.bf16 %v111_v10, %v110_v9  ;;  %v113_v15 = vld [vmem:[%s482_s3 + $0x28] sm:$0xff] }
   0x5   :  { %302 = vmatprep.subr.bf16.mxu0 %v361_v3  ;;  %307 = vmatpush3.bf16.msra.mxu1 %v306_v12 }
   0x6   :  { %308 = vmatprep.subr.bf16.mxu1 %v361_v3 }
   0x7   :  { %10 = vsyncpa [#allocation3], 0  ;;  %v21_v16 = vld [vmem:[%s479_s0] sm:$0xff]  ;;  %vm33_vm1 = vcmask 261120   ;;  %v312_v17 = vpack.c.bf16 %v113_v15, %v112_v14  ;;  %v114_v18 = vld [vmem:[%s482_s3 + $0x30] sm:$0xff]  ;;  %vm201_vm2 = vcmask 130048  }
   0x8   :  { %304 = vmatpush3.bf16.msra.mxu0 %v303_v11  ;;  %v115_v19 = vld [vmem:[%s482_s3 + $0x38] sm:$0xff]  ;;  %v116_v21 = vld [vmem:[%s482_s3 + $0x40] sm:$0xff]  ;;  %v117_v22 = vld [vmem:[%s482_s3 + $0x48] sm:$0xff] }
   0x9   :  { %310 = vmatpush3.bf16.msra.mxu1 %v309_v13  ;;  %v315_v20 = vpack.c.bf16 %v115_v19, %v114_v18  ;;  %v318_v23 = vpack.c.bf16 %v117_v22, %v116_v21  ;;  %v118_v24 = vld [vmem:[%s482_s3 + $0x50] sm:$0xff]  ;;  %v119_v25 = vld [vmem:[%s482_s3 + $0x58] sm:$0xff]  ;;  %v120_v27 = vld [vmem:[%s482_s3 + $0x60] sm:$0xff] }
   0xa   :  { %311 = vmatprep.subr.bf16.mxu1 %v361_v3  ;;  %v321_v26 = vpack.c.bf16 %v119_v25, %v118_v24  ;;  %v121_v28 = vld [vmem:[%s482_s3 + $0x68] sm:$0xff]  ;;  %v122_v30 = vld [vmem:[%s482_s3 + $0x70] sm:$0xff]  ;;  %v123_v31 = vld [vmem:[%s482_s3 + $0x78] sm:$0xff] }
   0xb   :  { %262 = vmatmul.mubr.msk.f32.vlgmr.msra.gmra.mrb[0].mxu0 %vm33_vm1, %v21_v16  ;;  %v324_v29 = vpack.c.bf16 %v121_v28, %v120_v27  ;;  %v327_v32 = vpack.c.bf16 %v123_v31, %v122_v30  ;;  %v228_v33 = vld [vmem:[%s481_s2] ss:$0 sm:$0xff]  ;;  %s364_s2 = smov [#allocation2]  }
   0xc   :  { %v230_v38 = vld [vmem:[%s483_s4] ss:$0 sm:$0xff]  ;;  %s220_s3 = sshll.u32 %s364_s2, 4  ;;  %s221_s3 = int_to_ptr.vmem [resolvable:$true] %s220_s3 }
   0xd   :  { %313 = vmatpush3.bf16.msra.mxu1 %v312_v17  ;;  %s337_s4 = scalar_lea.vmem %s221_s3, 128  ;;  %p342_p1 = scmp.lt.s32.totalorder %s221_s3, %s221_s3 }
   0xe   :  { %314 = vmatprep.subr.bf16.mxu1 %v361_v3  ;;  %p338_p0 = scmp.ne.s32.totalorder %s221_s3, %s337_s4  ;;  %p343_p2 = scmp.lt.s32.totalorder %s337_s4, %s337_s4 }
  0x10   :  { %p344_p3 = por %p343_p2, %p342_p1 }
  0x11   :  { %316 = vmatpush3.bf16.msra.mxu1 %v315_v20 }
  0x12   :  { %317 = vmatprep.subr.bf16.mxu1 %v361_v3  ;;  %p345_p4 = pnand %p344_p3, %p338_p0 }
  0x15   :  { %319 = vmatpush3.bf16.msra.mxu1 %v318_v23 }
  0x16   :  { %320 = vmatprep.subr.bf16.mxu1 %v361_v3 }
  0x19   :  { %322 = vmatpush3.bf16.msra.mxu1 %v321_v26 }
  0x1a   :  { %323 = vmatprep.subr.bf16.mxu1 %v361_v3 }
  0x1d   :  { %325 = vmatpush3.bf16.msra.mxu1 %v324_v29 }
  0x1e   :  { %326 = vmatprep.subr.bf16.mxu1 %v361_v3 }
  0x21   :  { %328 = vmatpush3.bf16.msra.mxu1 %v327_v32 }
  0xde   :  { %v103_v34 = vpop.f32.mrb[0].mxu0 }
  0xdf   :  { %v104_v35 = vadd.f32 %v228_v33, %v103_v34  ;;  %v263_v36 = vpop.f32.mrb[1].mxu0 }
  0xe1   :  { %v107_v37 = vmax.f32 %v104_v35, 0.0 }
  0xe3   :  { %297 = vmatmul.mubr.f32.vlgmr.msra.gmra.mrb[0].mxu1 %v107_v37 }
 0x1b6   :  { %v197_v39 = vpop.f32.mrb[0].mxu1 }
 0x1b7   :  { %v198_v40 = vadd.f32 %v230_v38, %v197_v39  ;;  %v298_v41 = vpop.f32.mrb[1].mxu1 }
 0x1b9   :  { %v202_v42 = vsel %vm201_vm2, %v198_v40, -inf }
 0x1ba   :  { %203 = vmax.xlane.f32.xlu0 %v202_v42 }
 0x247   :  { %v204_v43 = vpop.xlane.xlu0 %203 }
 0x248   :  { %v205_v44 = vsub.f32 %v198_v40, %v204_v43 }
 0x24a   :  { %v206_v45 = vmul.f32 1.442695, %v205_v44 }
 0x24c   :  { %333 = vpow2.f32 %v206_v45 }
 0x256   :  { %v334_v46 = vpop.eup %333 }
 0x257   :  { %v208_v47 = vsel %vm201_vm2, %v334_v46, 0.0 }
 0x258   :  { %209 = vadd.xlane.f32.xlu0 %v208_v47 }
 0x2e5   :  { %v210_v48 = vpop.xlane.xlu0 %209 }
 0x2e6   :  { %335 = vrcp.f32 %v210_v48 }
 0x2f0   :  { %v336_v49 = vpop.eup %335 }
 0x2f1   :  { %v212_v50 = vmul.f32 %v336_v49, %v334_v46 }
 0x2f3   :  { %213 = vst.msk [vmem:[#allocation2] sm:$0xff] %vm201_vm2, %v212_v50 }
 0x2f4   :  { %348 = shalt.err (!%p345_p4)
}
 0x2f5   :  { %s349_s13 = scalar_lea.hbm %s484_s5, 128 }
 0x2f6   :  { %p350_p5 = scmp.ne.s32.totalorder %s484_s5, %s349_s13  ;;  %p353_p6 = scmp.lt.u32.totalorder %s349_s13, %s484_s5 }
 0x2f8   :  { %p355_p7 = pnand %p353_p6, %p350_p5 }
 0x2fa   :  { %358 = shalt.err (!%p355_p7)
}
 0x2fb   :  { %223 = dma.vmem_to_hbm [thread:$0]  %s221_s3, 128, %s484_s5, [#allocation3]  }
 0x2fc   :  { %359 = dma.done.wait [#allocation3], 128  }
 0x2fd   :  { %360 = vsyncadd [#allocation3], 4294967168 }
 0x2fe   :  { %227 = vsyncpa [#allocation3], 1 }

</bundles_post_ra>
